<compile_context>
chip_gen: v7x
topology: tpu7x:2x2x1
jax: 0.10.0
libtpu: 0.0.40
codegen_flags: <defaults>
</compile_context>

<pallas_src>
import functools

import jax
import jax.numpy as jnp
from jax.experimental import pallas as pl
from jax.experimental.pallas import tpu as pltpu


def cga_kernel(x_ref, p_ref, o_ref, *, wdim, cr):
    B, C, HW = x_ref.shape
    Cm = C // 2
    W = wdim
    L = B * HW                                      # lane-concatenated batch axis

    # ---------------- packed params (single DMA'd block) -------------------
    wfull = p_ref[0:C, 0:2 * Cm]                    # (C, 2Cm) folded final conv
    bfv = p_ref[0:C, 2 * Cm:2 * Cm + 1]             # (C, 1)   folded bias
    w1 = p_ref[C:C + cr, 0:Cm]                      # (Cr, Cm) SE fc1 (torch layout)
    w2 = p_ref[C:C + Cm, Cm:Cm + cr]                # (Cm, Cr) SE fc2 (torch layout)

    # ---------------- MyChannelAttention gate (VPU/XLU, f32) ---------------
    xa = x_ref[:, :Cm, :]                           # (B, Cm, HW) aligned sublane slice
    pooled = jnp.mean(xa, axis=2)                   # (B, Cm) global avg pool
    h1 = jnp.maximum(jnp.sum(pooled[:, None, :] * w1[None, :, :], axis=2), 0.0)  # (B, Cr)
    gate = jax.nn.sigmoid(jnp.sum(h1[:, None, :] * w2[None, :, :], axis=2))      # (B, Cm)
    cattn = xa * gate[:, :, None]                   # gate on activations (trivial VPU cost)
    ca_l = jnp.concatenate([cattn[b] for b in range(B)], axis=-1)   # (Cm, L) lane concat

    # ---------------- MySpatialAttention: separable 3x3 average pool -------
    # 3-tap sum along W then along H on the lane-flattened axis (pltpu.roll /
    # XLU); (1, L) edge masks reproduce zero padding (count_include_pad=True
    # -> /9) and also kill cross-image wrap-around at the b*HW boundaries.
    xb = x_ref[:, Cm:, :]                           # (B, Cm, HW)
    xb_l = jnp.concatenate([xb[b] for b in range(B)], axis=-1)       # (Cm, L)
    col = jax.lax.broadcasted_iota(jnp.int32, (1, L), 1)
    pos = col % HW                                  # position inside one image
    wpos = pos % W
    m_l = (wpos > 0).astype(jnp.float32)            # left neighbour exists
    m_r = (wpos < W - 1).astype(jnp.float32)        # right neighbour exists
    m_u = (pos >= W).astype(jnp.float32)            # row above exists
    m_d = (pos < HW - W).astype(jnp.float32)        # row below exists
    sw = xb_l
    sw = sw + m_l * pltpu.roll(xb_l, 1, 1)          # x[.., w-1]
    sw = sw + m_r * pltpu.roll(xb_l, L - 1, 1)      # x[.., w+1]
    x_avg = sw
    x_avg = x_avg + m_u * pltpu.roll(sw, W, 1)      # row h-1
    x_avg = x_avg + m_d * pltpu.roll(sw, L - W, 1)  # row h+1
    x_avg = x_avg * (1.0 / 9.0)                     # (Cm, L)

    # ---------------- single fused 1x1 conv + SiLU + residual --------------
    act = jnp.concatenate([ca_l, x_avg], axis=0)    # (2Cm, L) sublane concat @ row Cm
    h = jnp.dot(wfull.astype(jnp.bfloat16), act.astype(jnp.bfloat16),
                preferred_element_type=jnp.float32) + bfv            # (C, L) f32
    h = h * jax.nn.sigmoid(h)                       # SiLU
    for b in range(B):                              # static, lane-aligned slices
        o_ref[b] = h[:, b * HW:(b + 1) * HW] + x_ref[b]   # residual with full input


@functools.partial(jax.jit, static_argnames=("cr",))
def cga_attention(x_nchw, packed, *, cr):
    B, C, H, W = x_nchw.shape
    HW = H * W
    x = x_nchw.reshape(B, C, HW).astype(jnp.float32)     # free reshape, no transpose
    out = pl.pallas_call(
        functools.partial(cga_kernel, wdim=W, cr=cr),
        out_shape=jax.ShapeDtypeStruct((B, C, HW), jnp.float32),
        grid=(1,),
        in_specs=[
            pl.BlockSpec((B, C, HW), lambda i: (0, 0, 0)),
            pl.BlockSpec(packed.shape, lambda i: (0, 0)),
        ],
        out_specs=pl.BlockSpec((B, C, HW), lambda i: (0, 0, 0)),
        compiler_params=pltpu.CompilerParams(dimension_semantics=("arbitrary",)),
    )(x, packed)
    return out.reshape(B, C, H, W)


def make_raw_params(key, dim, reduction=8, radio=0.5):
    """Deterministic synthetic parameters matching the torch module's shapes."""
    Cm = int(dim * radio)
    Cr = Cm // reduction
    ks = jax.random.split(key, 8)
    fc1 = jax.random.normal(ks[0], (Cr, Cm), jnp.float32) * 0.2     # Linear(Cm->Cr), no bias
    fc2 = jax.random.normal(ks[1], (Cm, Cr), jnp.float32) * 0.2     # Linear(Cr->Cm), no bias
    wsa = jax.random.normal(ks[2], (Cm, 2 * Cm), jnp.float32) * 0.2  # Conv2d(2Cm->Cm,1) weight
    bsa = jax.random.normal(ks[3], (Cm,), jnp.float32) * 0.1         # its bias
    wc = jax.random.normal(ks[4], (dim, dim), jnp.float32) * 0.2     # Conv2d(dim->dim,1), no bias
    gamma = 1.0 + 0.1 * jax.random.normal(ks[5], (dim,), jnp.float32)
    beta = 0.1 * jax.random.normal(ks[6], (dim,), jnp.float32)
    rmean = 0.05 * jax.random.normal(ks[7], (dim,), jnp.float32)
    rvar = jnp.ones((dim,), jnp.float32)
    return fc1, fc2, wsa, bsa, wc, gamma, beta, rmean, rvar


def fold_and_pack(fc1, fc2, wsa, bsa, wc, gamma, beta, rmean, rvar, eps=1e-3):
    """Exact algebraic folds + packing into one (C+Cm, 2Cm+1) kernel parameter array.

    eps=1e-3 matches ultralytics Conv's BatchNorm2d(eps=0.001); change if the
    deployed module uses a different eps.
    """
    Cm = fc2.shape[0]
    Cr = fc1.shape[0]
    C = wc.shape[0]
    sc = gamma / jnp.sqrt(rvar + eps)                 # fold BN (inference) into the conv
    wc_f = wc * sc[:, None]
    bc_f = beta - rmean * sc
    wsa_eff = wsa[:, :Cm] + wsa[:, Cm:]               # x_max == x_avg -> sum weight halves
    wfull = jnp.concatenate([wc_f[:, :Cm],            # channel-attention half
                             wc_f[:, Cm:] @ wsa_eff], axis=1)   # spatial conv folded in
    bf = wc_f[:, Cm:] @ bsa + bc_f                    # combined bias, (C,)
    packed = jnp.zeros((C + Cm, 2 * Cm + 1), jnp.float32)
    packed = packed.at[:C, :2 * Cm].set(wfull)
    packed = packed.at[:C, 2 * Cm].set(bf)
    packed = packed.at[C:C + Cr, :Cm].set(fc1)
    packed = packed.at[C:C + Cm, Cm:Cm + Cr].set(fc2)
    return packed


def ref_forward(x, fc1, fc2, wsa, bsa, wc, gamma, beta, rmean, rvar, eps=1e-3):
    """Pure-JAX reference following the PyTorch module op-by-op (NCHW)."""
    B, C, H, W = x.shape
    Cm = C // 2
    xa, xb = x[:, :Cm], x[:, Cm:]
    pooled = jnp.mean(xa, axis=(2, 3))
    gate = jax.nn.sigmoid(jnp.maximum(pooled @ fc1.T, 0.0) @ fc2.T)
    cattn = xa * gate[:, :, None, None]
    xp = jnp.pad(xb, ((0, 0), (0, 0), (1, 1), (1, 1)))
    s = sum(xp[:, :, di:di + H, dj:dj + W] for di in range(3) for dj in range(3))
    x_avg = s / 9.0
    cat2 = jnp.concatenate([x_avg, x_avg], axis=1)    # reference bug: both branches = avgpool
    sattn = jnp.einsum('oi,bihw->bohw', wsa, cat2) + bsa[None, :, None, None]
    feat = jnp.concatenate([cattn, sattn], axis=1)
    z = jnp.einsum('oi,bihw->bohw', wc, feat)
    sc = gamma / jnp.sqrt(rvar + eps)
    zbn = (z - rmean[None, :, None, None]) * sc[None, :, None, None] + beta[None, :, None, None]
    h = zbn * jax.nn.sigmoid(zbn)
    return h + x


if __name__ == "__main__":
    key = jax.random.PRNGKey(0)
    B, dim, H, W = 2, 32, 16, 16            # middle_dim = 16, reduced = 16 // 8 = 2
    kx, kp = jax.random.split(key)
    x = jax.random.normal(kx, (B, dim, H, W), jnp.float32)
    raw = make_raw_params(kp, dim, reduction=8, radio=0.5)
    packed = fold_and_pack(*raw)
    Cr = raw[0].shape[0]

    out = cga_attention(x, packed, cr=Cr)
    out = jax.block_until_ready(out)

    ref = ref_forward(x, *raw)
    assert out.shape == (B, dim, H, W)
    max_err = float(jnp.max(jnp.abs(out - ref)))
    # bf16 MXU operands with f32 accumulation: expected max |err| is a few 1e-3;
    # 3e-2 is a comfortably safe bound that still catches real bugs.
    assert max_err < 3e-2, f"mismatch vs reference: {max_err}"
    print("KERNEL_OK")
</pallas_src>

<mosaic_0001>
module attributes {stable_mosaic.version = 11 : i64} {
  func.func @cga_kernel(%arg0: i32, %arg1: memref<2x32x256xf32, #tpu.memory_space<vmem>>, %arg2: memref<48x33xf32, #tpu.memory_space<vmem>>, %arg3: memref<2x32x256xf32, #tpu.memory_space<vmem>>) attributes {dimension_semantics = [#tpu.dimension_semantics<arbitrary>], iteration_bounds = array<i64: 1>, scalar_prefetch = 0 : i64, scratch_operands = 0 : i64, tpu.core_type = #tpu.core_type<tc>, window_params = [{pipeline_mode = #tpu.pipeline_mode<synchronous>, transform_indices = @transform_0, window_bounds = array<i64: 2, 32, 256>}, {pipeline_mode = #tpu.pipeline_mode<synchronous>, transform_indices = @transform_1, window_bounds = array<i64: 48, 33>}, {pipeline_mode = #tpu.pipeline_mode<synchronous>, transform_indices = @transform_2, window_bounds = array<i64: 2, 32, 256>}]} {
    %c0 = arith.constant 0 : index
    %c0_0 = arith.constant 0 : index
    %0 = vector.load %arg2[%c0, %c0_0] : memref<48x33xf32, #tpu.memory_space<vmem>>, vector<32x32xf32>
    %c0_1 = arith.constant 0 : index
    %c32 = arith.constant 32 : index
    %1 = vector.load %arg2[%c0_1, %c32] : memref<48x33xf32, #tpu.memory_space<vmem>>, vector<32x1xf32>
    %c32_2 = arith.constant 32 : index
    %c0_3 = arith.constant 0 : index
    %2 = vector.load %arg2[%c32_2, %c0_3] : memref<48x33xf32, #tpu.memory_space<vmem>>, vector<2x16xf32>
    %c32_4 = arith.constant 32 : index
    %c16 = arith.constant 16 : index
    %3 = vector.load %arg2[%c32_4, %c16] : memref<48x33xf32, #tpu.memory_space<vmem>>, vector<16x2xf32>
    %c0_5 = arith.constant 0 : index
    %c0_6 = arith.constant 0 : index
    %c0_7 = arith.constant 0 : index
    %4 = vector.load %arg1[%c0_5, %c0_6, %c0_7] : memref<2x32x256xf32, #tpu.memory_space<vmem>>, vector<2x16x256xf32>
    %cst = arith.constant dense<0.000000e+00> : vector<2x16xf32>
    %5 = vector.multi_reduction <add>, %4, %cst [2] : vector<2x16x256xf32> to vector<2x16xf32>
    %cst_8 = arith.constant 2.560000e+02 : f32
    %6 = vector.broadcast %cst_8 : f32 to vector<2x16xf32>
    %7 = arith.divf %5, %6 : vector<2x16xf32>
    %8 = vector.shape_cast %7 : vector<2x16xf32> to vector<2x1x16xf32>
    %9 = vector.shape_cast %2 : vector<2x16xf32> to vector<1x2x16xf32>
    %10 = vector.broadcast %8 : vector<2x1x16xf32> to vector<2x2x16xf32>
    %11 = vector.broadcast %9 : vector<1x2x16xf32> to vector<2x2x16xf32>
    %12 = arith.mulf %10, %11 : vector<2x2x16xf32>
    %cst_9 = arith.constant dense<0.000000e+00> : vector<2x2xf32>
    %13 = vector.multi_reduction <add>, %12, %cst_9 [2] : vector<2x2x16xf32> to vector<2x2xf32>
    %cst_10 = arith.constant 0.000000e+00 : f32
    %14 = vector.broadcast %cst_10 : f32 to vector<2x2xf32>
    %15 = arith.maximumf %13, %14 : vector<2x2xf32>
    %16 = vector.shape_cast %15 : vector<2x2xf32> to vector<2x1x2xf32>
    %17 = vector.shape_cast %3 : vector<16x2xf32> to vector<1x16x2xf32>
    %18 = vector.broadcast %16 : vector<2x1x2xf32> to vector<2x16x2xf32>
    %19 = vector.broadcast %17 : vector<1x16x2xf32> to vector<2x16x2xf32>
    %20 = arith.mulf %18, %19 : vector<2x16x2xf32>
    %cst_11 = arith.constant dense<0.000000e+00> : vector<2x16xf32>
    %21 = vector.multi_reduction <add>, %20, %cst_11 [2] : vector<2x16x2xf32> to vector<2x16xf32>
    %22 = arith.negf %21 : vector<2x16xf32>
    %23 = math.exp %22 : vector<2x16xf32>
    %cst_12 = arith.constant 1.000000e+00 : f32
    %24 = vector.broadcast %cst_12 : f32 to vector<2x16xf32>
    %25 = arith.addf %24, %23 : vector<2x16xf32>
    %26 = arith.divf %24, %25 : vector<2x16xf32>
    %27 = vector.shape_cast %26 : vector<2x16xf32> to vector<2x16x1xf32>
    %28 = vector.broadcast %27 : vector<2x16x1xf32> to vector<2x16x256xf32>
    %29 = arith.mulf %4, %28 : vector<2x16x256xf32>
    %30 = vector.extract_strided_slice %29 {offsets = [0, 0, 0], sizes = [1, 16, 256], strides = [1, 1, 1]} : vector<2x16x256xf32> to vector<1x16x256xf32>
    %31 = vector.shape_cast %30 : vector<1x16x256xf32> to vector<16x256xf32>
    %32 = vector.extract_strided_slice %29 {offsets = [1, 0, 0], sizes = [1, 16, 256], strides = [1, 1, 1]} : vector<2x16x256xf32> to vector<1x16x256xf32>
    %33 = vector.shape_cast %32 : vector<1x16x256xf32> to vector<16x256xf32>
    %34 = tpu.concatenate %31, %33 in 1 : vector<16x256xf32>, vector<16x256xf32> -> vector<16x512xf32>
    %c0_13 = arith.constant 0 : index
    %c16_14 = arith.constant 16 : index
    %c0_15 = arith.constant 0 : index
    %35 = vector.load %arg1[%c0_13, %c16_14, %c0_15] : memref<2x32x256xf32, #tpu.memory_space<vmem>>, vector<2x16x256xf32>
    %36 = vector.extract_strided_slice %35 {offsets = [0, 0, 0], sizes = [1, 16, 256], strides = [1, 1, 1]} : vector<2x16x256xf32> to vector<1x16x256xf32>
    %37 = vector.shape_cast %36 : vector<1x16x256xf32> to vector<16x256xf32>
    %38 = vector.extract_strided_slice %35 {offsets = [1, 0, 0], sizes = [1, 16, 256], strides = [1, 1, 1]} : vector<2x16x256xf32> to vector<1x16x256xf32>
    %39 = vector.shape_cast %38 : vector<1x16x256xf32> to vector<16x256xf32>
    %40 = tpu.concatenate %37, %39 in 1 : vector<16x256xf32>, vector<16x256xf32> -> vector<16x512xf32>
    %41 = tpu.iota {dimensions = array<i32: 1>} : vector<1x512xi32>
    %c256_i32 = arith.constant 256 : i32
    %c0_i32 = arith.constant 0 : i32
    %42 = arith.cmpi eq, %c256_i32, %c0_i32 : i32
    %c1_i32 = arith.constant 1 : i32
    %43 = arith.select %42, %c1_i32, %c256_i32 : i32
    %44 = vector.broadcast %43 : i32 to vector<1x512xi32>
    %45 = arith.remsi %41, %44 : vector<1x512xi32>
    %c0_i32_16 = arith.constant 0 : i32
    %46 = vector.broadcast %c0_i32_16 : i32 to vector<1x512xi32>
    %47 = arith.cmpi ne, %45, %46 : vector<1x512xi32>
    %c0_i32_17 = arith.constant 0 : i32
    %48 = vector.broadcast %c0_i32_17 : i32 to vector<1x512xi32>
    %49 = arith.cmpi slt, %45, %48 : vector<1x512xi32>
    %c0_i32_18 = arith.constant 0 : i32
    %50 = arith.cmpi slt, %43, %c0_i32_18 : i32
    %51 = vector.broadcast %50 : i1 to vector<1x512xi1>
    %52 = vector.broadcast %51 : vector<1x512xi1> to vector<1x512xi1>
    %53 = arith.xori %49, %52 : vector<1x512xi1>
    %54 = arith.andi %53, %47 : vector<1x512xi1>
    %55 = vector.broadcast %43 : i32 to vector<1x512xi32>
    %56 = arith.addi %45, %55 : vector<1x512xi32>
    %57 = arith.select %54, %56, %45 : vector<1x512xi1>, vector<1x512xi32>
    %c16_i32 = arith.constant 16 : i32
    %c0_i32_19 = arith.constant 0 : i32
    %58 = arith.cmpi eq, %c16_i32, %c0_i32_19 : i32
    %c1_i32_20 = arith.constant 1 : i32
    %59 = arith.select %58, %c1_i32_20, %c16_i32 : i32
    %60 = vector.broadcast %59 : i32 to vector<1x512xi32>
    %61 = arith.remsi %57, %60 : vector<1x512xi32>
    %c0_i32_21 = arith.constant 0 : i32
    %62 = vector.broadcast %c0_i32_21 : i32 to vector<1x512xi32>
    %63 = arith.cmpi ne, %61, %62 : vector<1x512xi32>
    %c0_i32_22 = arith.constant 0 : i32
    %64 = vector.broadcast %c0_i32_22 : i32 to vector<1x512xi32>
    %65 = arith.cmpi slt, %61, %64 : vector<1x512xi32>
    %c0_i32_23 = arith.constant 0 : i32
    %66 = arith.cmpi slt, %59, %c0_i32_23 : i32
    %67 = vector.broadcast %66 : i1 to vector<1x512xi1>
    %68 = vector.broadcast %67 : vector<1x512xi1> to vector<1x512xi1>
    %69 = arith.xori %65, %68 : vector<1x512xi1>
    %70 = arith.andi %69, %63 : vector<1x512xi1>
    %71 = vector.broadcast %59 : i32 to vector<1x512xi32>
    %72 = arith.addi %61, %71 : vector<1x512xi32>
    %73 = arith.select %70, %72, %61 : vector<1x512xi1>, vector<1x512xi32>
    %c0_i32_24 = arith.constant 0 : i32
    %74 = vector.broadcast %c0_i32_24 : i32 to vector<1x512xi32>
    %75 = arith.cmpi sgt, %73, %74 : vector<1x512xi32>
    %76 = arith.extui %75 : vector<1x512xi1> to vector<1x512xi32>
    %77 = arith.sitofp %76 : vector<1x512xi32> to vector<1x512xf32>
    %c15_i32 = arith.constant 15 : i32
    %78 = vector.broadcast %c15_i32 : i32 to vector<1x512xi32>
    %79 = arith.cmpi slt, %73, %78 : vector<1x512xi32>
    %80 = arith.extui %79 : vector<1x512xi1> to vector<1x512xi32>
    %81 = arith.sitofp %80 : vector<1x512xi32> to vector<1x512xf32>
    %c16_i32_25 = arith.constant 16 : i32
    %82 = vector.broadcast %c16_i32_25 : i32 to vector<1x512xi32>
    %83 = arith.cmpi sge, %57, %82 : vector<1x512xi32>
    %84 = arith.extui %83 : vector<1x512xi1> to vector<1x512xi32>
    %85 = arith.sitofp %84 : vector<1x512xi32> to vector<1x512xf32>
    %c240_i32 = arith.constant 240 : i32
    %86 = vector.broadcast %c240_i32 : i32 to vector<1x512xi32>
    %87 = arith.cmpi slt, %57, %86 : vector<1x512xi32>
    %88 = arith.extui %87 : vector<1x512xi1> to vector<1x512xi32>
    %89 = arith.sitofp %88 : vector<1x512xi32> to vector<1x512xf32>
    %c1_i32_26 = arith.constant 1 : i32
    %90 = tpu.dynamic_rotate %40 by %c1_i32_26 dim 1 : vector<16x512xf32>, i32 -> vector<16x512xf32>
    %91 = vector.broadcast %77 : vector<1x512xf32> to vector<16x512xf32>
    %92 = arith.mulf %91, %90 : vector<16x512xf32>
    %93 = arith.addf %40, %92 : vector<16x512xf32>
    %c511_i32 = arith.constant 511 : i32
    %94 = tpu.dynamic_rotate %40 by %c511_i32 dim 1 : vector<16x512xf32>, i32 -> vector<16x512xf32>
    %95 = vector.broadcast %81 : vector<1x512xf32> to vector<16x512xf32>
    %96 = arith.mulf %95, %94 : vector<16x512xf32>
    %97 = arith.addf %93, %96 : vector<16x512xf32>
    %c16_i32_27 = arith.constant 16 : i32
    %98 = tpu.dynamic_rotate %97 by %c16_i32_27 dim 1 : vector<16x512xf32>, i32 -> vector<16x512xf32>
    %99 = vector.broadcast %85 : vector<1x512xf32> to vector<16x512xf32>
    %100 = arith.mulf %99, %98 : vector<16x512xf32>
    %101 = arith.addf %97, %100 : vector<16x512xf32>
    %c496_i32 = arith.constant 496 : i32
    %102 = tpu.dynamic_rotate %97 by %c496_i32 dim 1 : vector<16x512xf32>, i32 -> vector<16x512xf32>
    %103 = vector.broadcast %89 : vector<1x512xf32> to vector<16x512xf32>
    %104 = arith.mulf %103, %102 : vector<16x512xf32>
    %105 = arith.addf %101, %104 : vector<16x512xf32>
    %cst_28 = arith.constant 0.111111112 : f32
    %106 = vector.broadcast %cst_28 : f32 to vector<16x512xf32>
    %107 = arith.mulf %105, %106 : vector<16x512xf32>
    %108 = tpu.concatenate %34, %107 in 0 : vector<16x512xf32>, vector<16x512xf32> -> vector<32x512xf32>
    %109 = arith.truncf %0 : vector<32x32xf32> to vector<32x32xbf16>
    %110 = arith.truncf %108 : vector<32x512xf32> to vector<32x512xbf16>
    %cst_29 = arith.constant dense<0.000000e+00> : vector<32x512xf32>
    %111 = tpu.matmul %109, %110, %cst_29 {dimension_numbers = #tpu.dot_dimension_numbers<[1], [0], [0], [1], [0, 0, 1, 1], [], []>} : vector<32x32xbf16>, vector<32x512xbf16>, vector<32x512xf32> -> vector<32x512xf32>
    %112 = vector.broadcast %1 : vector<32x1xf32> to vector<32x512xf32>
    %113 = arith.addf %111, %112 : vector<32x512xf32>
    %114 = arith.negf %113 : vector<32x512xf32>
    %115 = math.exp %114 : vector<32x512xf32>
    %cst_30 = arith.constant 1.000000e+00 : f32
    %116 = vector.broadcast %cst_30 : f32 to vector<32x512xf32>
    %117 = arith.addf %116, %115 : vector<32x512xf32>
    %118 = arith.divf %116, %117 : vector<32x512xf32>
    %119 = arith.mulf %113, %118 : vector<32x512xf32>
    %120 = vector.extract_strided_slice %119 {offsets = [0, 0], sizes = [32, 256], strides = [1, 1]} : vector<32x512xf32> to vector<32x256xf32>
    %c0_31 = arith.constant 0 : index
    %c0_32 = arith.constant 0 : index
    %c0_33 = arith.constant 0 : index
    %121 = vector.load %arg1[%c0_31, %c0_32, %c0_33] : memref<2x32x256xf32, #tpu.memory_space<vmem>>, vector<1x32x256xf32>
    %122 = vector.shape_cast %121 : vector<1x32x256xf32> to vector<32x256xf32>
    %123 = arith.addf %120, %122 : vector<32x256xf32>
    %c0_34 = arith.constant 0 : index
    %c0_35 = arith.constant 0 : index
    %c0_36 = arith.constant 0 : index
    %124 = vector.load %arg3[%c0_34, %c0_35, %c0_36] : memref<2x32x256xf32, #tpu.memory_space<vmem>>, vector<1x32x256xf32>
    %125 = vector.shape_cast %124 : vector<1x32x256xf32> to vector<32x256xf32>
    %126 = vector.shape_cast %123 : vector<32x256xf32> to vector<1x32x256xf32>
    tpu.vector_store %arg3[%c0_34, %c0_35, %c0_36], %126 {strides = array<i32>} : memref<2x32x256xf32, #tpu.memory_space<vmem>>, vector<1x32x256xf32>,
    %127 = vector.extract_strided_slice %119 {offsets = [0, 256], sizes = [32, 256], strides = [1, 1]} : vector<32x512xf32> to vector<32x256xf32>
    %c1 = arith.constant 1 : index
    %c0_37 = arith.constant 0 : index
    %c0_38 = arith.constant 0 : index
    %128 = vector.load %arg1[%c1, %c0_37, %c0_38] : memref<2x32x256xf32, #tpu.memory_space<vmem>>, vector<1x32x256xf32>
    %129 = vector.shape_cast %128 : vector<1x32x256xf32> to vector<32x256xf32>
    %130 = arith.addf %127, %129 : vector<32x256xf32>
    %c1_39 = arith.constant 1 : index
    %c0_40 = arith.constant 0 : index
    %c0_41 = arith.constant 0 : index
    %131 = vector.load %arg3[%c1_39, %c0_40, %c0_41] : memref<2x32x256xf32, #tpu.memory_space<vmem>>, vector<1x32x256xf32>
    %132 = vector.shape_cast %131 : vector<1x32x256xf32> to vector<32x256xf32>
    %133 = vector.shape_cast %130 : vector<32x256xf32> to vector<1x32x256xf32>
    tpu.vector_store %arg3[%c1_39, %c0_40, %c0_41], %133 {strides = array<i32>} : memref<2x32x256xf32, #tpu.memory_space<vmem>>, vector<1x32x256xf32>,
    return
  }
  func.func @transform_0(%arg0: i32) -> (i32, i32, i32) {
    %c0_i32 = arith.constant 0 : i32
    %c0_i32_0 = arith.constant 0 : i32
    %c0_i32_1 = arith.constant 0 : i32
    %c0_i32_2 = arith.constant 0 : i32
    return %c0_i32, %c0_i32_0, %c0_i32_1 : i32, i32, i32
  }
  func.func @transform_1(%arg0: i32) -> (i32, i32) {
    %c0_i32 = arith.constant 0 : i32
    %c0_i32_0 = arith.constant 0 : i32
    %c0_i32_1 = arith.constant 0 : i32
    return %c0_i32, %c0_i32_0 : i32, i32
  }
  func.func @transform_2(%arg0: i32) -> (i32, i32, i32) {
    %c0_i32 = arith.constant 0 : i32
    %c0_i32_0 = arith.constant 0 : i32
    %c0_i32_1 = arith.constant 0 : i32
    %c0_i32_2 = arith.constant 0 : i32
    return %c0_i32, %c0_i32_0, %c0_i32_1 : i32, i32, i32
  }
}

</mosaic_0001>

<bundles_post_ra>
// kernel: cga_attention.1
= control target key start
LH: loop header
LB: loop body
LE: loop exit
PB: predicated region body
PF: predicated region fallthrough
CT: control target
= control target key end

     0   :  { %v45_v12 = vlaneseq  ;;  %v1473_v20 = vmov 0   ;;  %s1474_s7 = smov 1   ;;  %vm122_vm0 = vcmask 130112   ;;  %vm151_vm1 = vcmask 1041409   ;;  %s1475_s20 = smov 127   ;;  %s2156_s0 = inlined_call_operand.vmem [shape: f32[2,32,256], index: 0, kind: input, shape index: {}]   ;;  %s2157_s1 = inlined_call_operand.vmem [shape: f32[48,33], index: 1, kind: input, shape index: {}]   ;;  %s2158_s2 = inlined_call_operand.vmem [shape: f32[2,32,256], index: 2, kind: output, shape index: {}]  }
   0x1   :  { %v23_v0 = vld [vmem:[%s2156_s0 + $0x40] sm:$0xff]  ;;  %v24_v1 = vld [vmem:[%s2156_s0 + $0x48] sm:$0xff]  ;;  %v25_v5 = vld [vmem:[%s2156_s0 + $0x50] sm:$0xff]  ;;  %1378 = vset.pattern.permute.xlu1 %v1473_v20  ;;  %1377 = vset.pattern.permute.xlu0 %v1473_v20  ;;  %vm156_vm2 = vcmask 123904   ;;  %vm600_vm3 = vcmask 1042434   ;;  %vm602_vm4 = vcmask 1043459  }
   0x2   :  { %v19_v2 = vld [vmem:[%s2156_s0] sm:$0xff]  ;;  %v33_v3 = vadd.f32 %v24_v1, %v23_v0  ;;  %v20_v4 = vld [vmem:[%s2156_s0 + $0x8] sm:$0xff]  ;;  %v26_v6 = vld [vmem:[%s2156_s0 + $0x58] sm:$0xff]  ;;  %v1520_v13 = vshrl.u32 %v45_v12, 7  ;;  %1131 = vmatprep.mubr.bf16.mxu1 %v1473_v20  ;;  %1078 = vmatprep.mubr.bf16.mxu0 %v1473_v20  ;;  %vm604_vm5 = vcmask 1044484   ;;  %vm606_vm6 = vcmask 1045509  }
   0x3   :  { %v27_v7 = vadd.f32 %v20_v4, %v19_v2  ;;  %v21_v8 = vld [vmem:[%s2156_s0 + $0x10] sm:$0xff]  ;;  %v22_v9 = vld [vmem:[%s2156_s0 + $0x18] sm:$0xff]  ;;  %v36_v10 = vadd.f32 %v26_v6, %v25_v5  ;;  %v16_v15 = vld [vmem:[%s2157_s1 + $0x20] sm:$0x3]  ;;  %v1582_v4 = vand.u32 127, %v45_v12  ;;  %vm608_vm7 = vcmask 1046534  }
   0x4   :  { %34 = vadd.xlane.f32.xlu1 %v33_v3  ;;  %v30_v11 = vadd.f32 %v22_v9, %v21_v8  ;;  %v47_v14 = vsub.s32 0, %v1520_v13  ;;  %v58_v17 = vsub.s32 1, %v1520_v13  ;;  %v1530_v19 = vld [vmem:[%s2157_s1 + $0x20] sm:$0xff]  ;;  %v18_v42 = vld [vmem:[%s2157_s1 + $0x28] sm:$0xff]  ;;  %v185_v45 = vsub.s32 2, %v1520_v13  ;;  %v1561_v1 = vld [vmem:[%s2156_s0 + $0x30] sm:$0xff] }
   0x5   :  { %28 = vadd.xlane.f32.xlu0 %v27_v7  ;;  %v193_v48 = vsub.s32 3, %v1520_v13  ;;  %v201_v51 = vsub.s32 4, %v1520_v13  ;;  %v209_v54 = vsub.s32 5, %v1520_v13  ;;  %v217_v57 = vsub.s32 6, %v1520_v13  ;;  %v1556_v0 = vld [vmem:[%s2156_s0 + $0x20] sm:$0xff]  ;;  %v1570_v2 = vld [vmem:[%s2156_s0 + $0x28] sm:$0xff] }
   0x6   :  { %v48_v16 = vrot.slane %v16_v15, %v47_v14  ;;  %v59_v18 = vrot.slane %v16_v15, %v58_v17  ;;  %v170_v21 = vrot.slane %v1530_v19, %v47_v14  ;;  %v178_v22 = vrot.slane %v1530_v19, %v58_v17  ;;  %v1575_v3 = vld [vmem:[%s2156_s0 + $0x38] sm:$0xff]  ;;  %s1477_s21 = smov 16   ;;  %s1478_s22 = smov 112  }
   0x7   :  { %v234_v44 = vrot.slane %v18_v42, %v47_v14  ;;  %v242_v46 = vrot.slane %v18_v42, %v58_v17  ;;  %v186_v47 = vrot.slane %v1530_v19, %v185_v45  ;;  %v250_v49 = vrot.slane %v18_v42, %v185_v45 }
   0x8   :  { %37 = vadd.xlane.f32.xlu1 %v36_v10  ;;  %v194_v50 = vrot.slane %v1530_v19, %v193_v48  ;;  %v258_v52 = vrot.slane %v18_v42, %v193_v48  ;;  %v202_v53 = vrot.slane %v1530_v19, %v201_v51  ;;  %v266_v55 = vrot.slane %v18_v42, %v201_v51 }
   0x9   :  { %31 = vadd.xlane.f32.xlu0 %v30_v11  ;;  %v210_v56 = vrot.slane %v1530_v19, %v209_v54  ;;  %v274_v58 = vrot.slane %v18_v42, %v209_v54  ;;  %v218_v59 = vrot.slane %v1530_v19, %v217_v57  ;;  %v225_v60 = vsub.s32 7, %v1520_v13 }
   0xa   :  { %v282_v61 = vrot.slane %v18_v42, %v217_v57  ;;  %v117_v5 = vadd.s32 4294967288, %v1582_v4  ;;  %v1589_v8 = vsub.s32 %v1582_v4, %v1520_v13  ;;  %vm610_vm8 = vcmask 1047559  }
   0xb   :  { %v226_v62 = vrot.slane %v1530_v19, %v225_v60  ;;  %v290_v63 = vrot.slane %v18_v42, %v225_v60  ;;  %vm853_vm11 = vcmp.lt.s32.totalorder %v1582_v4, 1  ;;  %vm894_vm13 = vcmp.lt.s32.totalorder %v1582_v4, 127 }
   0xc   :  { %v120_v9 = vsub.s32 %v117_v5, %v1520_v13 }
  0x19   :  { %54 = vbcast.lane.b32.xlu1 %v48_v16, 264 }
  0x1d   :  { %61 = vbcast.lane.b32.xlu1 %v59_v18, 256 }
  0x1f   :  { %50 = vbcast.lane.b32.xlu0 %v48_v16, 256 }
  0x21   :  { %65 = vbcast.lane.b32.xlu1 %v59_v18, 264 }
  0x23   :  { %173 = vbcast.lane.b32.xlu0 %v170_v21, 272 }
  0x91   :  { %v35_v23 = vpop.xlane.xlu1 %34 }
  0x92   :  { %v29_v24 = vpop.xlane.xlu0 %28  ;;  %v42_v35 = vmul.f32 0.00390625, %v35_v23 }
  0x93   :  { %v40_v28 = vmul.f32 0.00390625, %v29_v24 }
  0x95   :  { %v38_v25 = vpop.xlane.xlu1 %37 }
  0x96   :  { %v32_v26 = vpop.xlane.xlu0 %31  ;;  %v43_v39 = vmul.f32 0.00390625, %v38_v25 }
  0x97   :  { %v41_v27 = vmul.f32 0.00390625, %v32_v26 }
  0x99   :  { %v55_v29 = vpop.permute.xlu1 %54 }
  0x9a   :  { %v72_v30 = vmul.f32 %v55_v29, %v41_v27  ;;  %v51_v31 = vpop.permute.xlu0 %50  ;;  %v76_v40 = vmul.f32 %v55_v29, %v43_v39 }
  0x9b   :  { %v71_v32 = vmul.f32 %v51_v31, %v40_v28  ;;  %v75_v37 = vmul.f32 %v51_v31, %v42_v35 }
  0x9c   :  { %91 = vperm.xlu1 %1378, %v72_v30  }
  0x9d   :  { %88 = vperm.xlu0 %1377, %v71_v32   ;;  %v62_v33 = vpop.permute.xlu1 %61 }
  0x9e   :  { %v73_v34 = vmul.f32 %v62_v33, %v40_v28  ;;  %v77_v41 = vmul.f32 %v62_v33, %v42_v35  ;;  %v1585_v6 = vpop.permute.xlu0 %173 }
  0xa0   :  { %94 = vperm.xlu1 %1378, %v73_v34  }
  0xa1   :  { %v66_v36 = vpop.permute.xlu1 %65 }
  0xa2   :  { %v74_v38 = vmul.f32 %v66_v36, %v41_v27  ;;  %v78_v43 = vmul.f32 %v66_v36, %v43_v39 }
  0xa4   :  { %100 = vperm.xlu1 %1378, %v75_v37   ;;  %97 = vperm.xlu0 %1377, %v74_v38  }
  0xa8   :  { %106 = vperm.xlu1 %1378, %v77_v41   ;;  %103 = vperm.xlu0 %1377, %v76_v40  }
  0xac   :  { %109 = vperm.xlu0 %1377, %v78_v43   ;;  %181 = vbcast.lane.b32.xlu1 %v178_v22, 272 }
  0xb0   :  { %237 = vbcast.lane.b32.xlu1 %v234_v44, 272  ;;  %245 = vbcast.lane.b32.xlu0 %v242_v46, 272 }
  0xb4   :  { %189 = vbcast.lane.b32.xlu1 %v186_v47, 272  ;;  %253 = vbcast.lane.b32.xlu0 %v250_v49, 272 }
  0xb8   :  { %197 = vbcast.lane.b32.xlu1 %v194_v50, 272  ;;  %261 = vbcast.lane.b32.xlu0 %v258_v52, 272 }
  0xbc   :  { %205 = vbcast.lane.b32.xlu1 %v202_v53, 272  ;;  %269 = vbcast.lane.b32.xlu0 %v266_v55, 272 }
  0xc0   :  { %213 = vbcast.lane.b32.xlu1 %v210_v56, 272  ;;  %277 = vbcast.lane.b32.xlu0 %v274_v58, 272 }
  0xc4   :  { %221 = vbcast.lane.b32.xlu1 %v218_v59, 272  ;;  %285 = vbcast.lane.b32.xlu0 %v282_v61, 272 }
  0xc8   :  { %229 = vbcast.lane.b32.xlu1 %v226_v62, 272  ;;  %293 = vbcast.lane.b32.xlu0 %v290_v63, 272 }
  0xcc   :  { %837 = vrot.lane.b32.xlu1 %v1556_v0, %s1474_s7  ;;  %839 = vrot.lane.b32.xlu0 %v1561_v1, %s1474_s7 }
  0xd0   :  { %841 = vrot.lane.b32.xlu1 %v1570_v2, %s1474_s7  ;;  %843 = vrot.lane.b32.xlu0 %v1575_v3, %s1474_s7 }
 0x11b   :  { %v92_v7 = vpop.permute.xlu1 %91 }
 0x11c   :  { %v89_v10 = vpop.permute.xlu0 %88  ;;  %v121_v14 = vrot.slane %v92_v7, %v120_v9 }
 0x11d   :  { %v116_v15 = vrot.slane %v89_v10, %v1589_v8 }
 0x11f   :  { %v95_v11 = vpop.permute.xlu1 %94  ;;  %v123_v19 = vsel %vm122_vm0, %v121_v14, %v116_v15 }
 0x120   :  { %v127_v12 = vrot.slane %v95_v11, %v1589_v8 }
 0x123   :  { %v101_v16 = vpop.permute.xlu1 %100  ;;  %v98_v17 = vpop.permute.xlu0 %97 }
 0x124   :  { %v131_v18 = vrot.slane %v98_v17, %v120_v9  ;;  %v136_v27 = vrot.slane %v101_v16, %v1589_v8 }
 0x126   :  { %v132_v21 = vsel %vm122_vm0, %v131_v18, %v127_v12 }
 0x127   :  { %v104_v22 = vpop.permute.xlu0 %103  ;;  %v152_v13 = vsel %vm151_vm1, %v132_v21, %v123_v19  ;;  %v107_v24 = vpop.permute.xlu1 %106 }
 0x128   :  { %v157_v23 = vsel %vm156_vm2, %v152_v13, 0.0  ;;  %v140_v25 = vrot.slane %v104_v22, %v120_v9  ;;  %v145_v28 = vrot.slane %v107_v24, %v1589_v8 }
 0x129   :  { %158 = vadd.xlane.f32.xlu1 %v157_v23 }
 0x12a   :  { %v141_v30 = vsel %vm122_vm0, %v140_v25, %v136_v27 }
 0x12b   :  { %v110_v26 = vpop.permute.xlu0 %109  ;;  %v182_v34 = vpop.permute.xlu1 %181 }
 0x12c   :  { %v149_v29 = vrot.slane %v110_v26, %v120_v9 }
 0x12e   :  { %v150_v31 = vsel %vm122_vm0, %v149_v29, %v145_v28 }
 0x12f   :  { %v153_v32 = vsel %vm151_vm1, %v150_v31, %v141_v30  ;;  %v238_v35 = vpop.permute.xlu1 %237  ;;  %v246_v37 = vpop.permute.xlu0 %245  ;;  %v1627_v30 = vld [vmem:[%s2156_s0 + $0x70] sm:$0xff] }
 0x130   :  { %v160_v33 = vsel %vm156_vm2, %v153_v32, 0.0  ;;  %v1635_v32 = vld [vmem:[%s2156_s0 + $0x60] sm:$0xff] }
 0x131   :  { %161 = vadd.xlane.f32.xlu0 %v160_v33 }
 0x133   :  { %v190_v36 = vpop.permute.xlu1 %189  ;;  %v254_v39 = vpop.permute.xlu0 %253 }
 0x137   :  { %v198_v38 = vpop.permute.xlu1 %197  ;;  %v262_v41 = vpop.permute.xlu0 %261 }
 0x13b   :  { %v206_v40 = vpop.permute.xlu1 %205  ;;  %v270_v43 = vpop.permute.xlu0 %269 }
 0x13f   :  { %v214_v42 = vpop.permute.xlu1 %213  ;;  %v278_v45 = vpop.permute.xlu0 %277 }
 0x143   :  { %v1604_v44 = vpop.permute.xlu1 %221  ;;  %v286_v47 = vpop.permute.xlu0 %285 }
 0x147   :  { %v1606_v46 = vpop.permute.xlu1 %229  ;;  %v1610_v49 = vpop.permute.xlu0 %293 }
 0x14b   :  { %v1608_v48 = vpop.permute.xlu1 %837  ;;  %v1614_v51 = vpop.permute.xlu0 %839 }
 0x14f   :  { %v1612_v50 = vpop.permute.xlu1 %841  ;;  %v1617_v56 = vpop.permute.xlu0 %843 }
 0x1b6   :  { %v159_v52 = vpop.xlane.xlu1 %158 }
 0x1b7   :  { %v163_v53 = vmax.f32 %v159_v52, 0.0 }
 0x1b9   :  { %v311_v54 = vmul.f32 %v1585_v6, %v163_v53  ;;  %v312_v55 = vmul.f32 %v182_v34, %v163_v53  ;;  %v319_v57 = vmul.f32 %v238_v35, %v163_v53  ;;  %v320_v58 = vmul.f32 %v246_v37, %v163_v53 }
 0x1ba   :  { %v321_v7 = vmul.f32 %v254_v39, %v163_v53  ;;  %v313_v9 = vmul.f32 %v190_v36, %v163_v53  ;;  %v322_v14 = vmul.f32 %v262_v41, %v163_v53  ;;  %v314_v15 = vmul.f32 %v198_v38, %v163_v53 }
 0x1bb   :  { %376 = vperm.xlu1 %1378, %v311_v54   ;;  %379 = vperm.xlu0 %1377, %v312_v55   ;;  %v323_v17 = vmul.f32 %v270_v43, %v163_v53  ;;  %v315_v12 = vmul.f32 %v206_v40, %v163_v53  ;;  %v324_v21 = vmul.f32 %v278_v45, %v163_v53 }
 0x1bc   :  { %v316_v22 = vmul.f32 %v214_v42, %v163_v53  ;;  %v325_v24 = vmul.f32 %v286_v47, %v163_v53  ;;  %v317_v25 = vmul.f32 %v1604_v44, %v163_v53  ;;  %v326_v28 = vmul.f32 %v1610_v49, %v163_v53 }
 0x1bd   :  { %v318_v29 = vmul.f32 %v1606_v46, %v163_v53 }
 0x1be   :  { %v162_v59 = vpop.xlane.xlu0 %161 }
 0x1bf   :  { %v164_v60 = vmax.f32 %v162_v59, 0.0  ;;  %400 = vperm.xlu1 %1378, %v319_v57   ;;  %403 = vperm.xlu0 %1377, %v320_v58  }
 0x1c1   :  { %v328_v61 = vmul.f32 %v182_v34, %v164_v60  ;;  %v327_v62 = vmul.f32 %v1585_v6, %v164_v60  ;;  %v336_v63 = vmul.f32 %v246_v37, %v164_v60  ;;  %v335_v5 = vmul.f32 %v238_v35, %v164_v60  ;;  %v1643_v34 = vld [vmem:[%s2156_s0 + $0x78] sm:$0xff]  ;;  %v1648_v35 = vld [vmem:[%s2156_s0 + $0x68] sm:$0xff] }
 0x1c2   :  { %v337_v10 = vmul.f32 %v254_v39, %v164_v60  ;;  %v329_v11 = vmul.f32 %v190_v36, %v164_v60  ;;  %v338_v16 = vmul.f32 %v262_v41, %v164_v60  ;;  %v330_v6 = vmul.f32 %v198_v38, %v164_v60 }
 0x1c3   :  { %427 = vperm.xlu0 %1377, %v328_v61   ;;  %424 = vperm.xlu1 %1378, %v327_v62   ;;  %v339_v18 = vmul.f32 %v270_v43, %v164_v60  ;;  %v331_v19 = vmul.f32 %v206_v40, %v164_v60  ;;  %v340_v13 = vmul.f32 %v278_v45, %v164_v60 }
 0x1c4   :  { %v332_v23 = vmul.f32 %v214_v42, %v164_v60  ;;  %v341_v26 = vmul.f32 %v286_v47, %v164_v60  ;;  %v333_v27 = vmul.f32 %v1604_v44, %v164_v60  ;;  %v334_v31 = vmul.f32 %v1606_v46, %v164_v60 }
 0x1c5   :  { %v342_v33 = vmul.f32 %v1610_v49, %v164_v60 }
 0x1c7   :  { %451 = vperm.xlu0 %1377, %v336_v63   ;;  %448 = vperm.xlu1 %1378, %v335_v5  }
 0x1cb   :  { %406 = vperm.xlu0 %1377, %v321_v7   ;;  %382 = vperm.xlu1 %1378, %v313_v9  }
 0x1cf   :  { %454 = vperm.xlu0 %1377, %v337_v10   ;;  %430 = vperm.xlu1 %1378, %v329_v11  }
 0x1d3   :  { %409 = vperm.xlu0 %1377, %v322_v14   ;;  %385 = vperm.xlu1 %1378, %v314_v15  }
 0x1d7   :  { %457 = vperm.xlu0 %1377, %v338_v16   ;;  %433 = vperm.xlu1 %1378, %v330_v6  }
 0x1db   :  { %412 = vperm.xlu0 %1377, %v323_v17   ;;  %388 = vperm.xlu1 %1378, %v315_v12  }
 0x1df   :  { %460 = vperm.xlu0 %1377, %v339_v18   ;;  %436 = vperm.xlu1 %1378, %v331_v19  }
 0x1e3   :  { %415 = vperm.xlu0 %1377, %v324_v21   ;;  %391 = vperm.xlu1 %1378, %v316_v22  }
 0x1e7   :  { %463 = vperm.xlu0 %1377, %v340_v13   ;;  %439 = vperm.xlu1 %1378, %v332_v23  }
 0x1eb   :  { %418 = vperm.xlu0 %1377, %v325_v24   ;;  %394 = vperm.xlu1 %1378, %v317_v25  }
 0x1ef   :  { %466 = vperm.xlu0 %1377, %v341_v26   ;;  %442 = vperm.xlu1 %1378, %v333_v27  }
 0x1f3   :  { %421 = vperm.xlu0 %1377, %v326_v28   ;;  %397 = vperm.xlu1 %1378, %v318_v29  }
 0x1f7   :  { %847 = vrot.lane.b32.xlu0 %v1627_v30, %s1474_s7  ;;  %445 = vperm.xlu1 %1378, %v334_v31  }
 0x1fb   :  { %469 = vperm.xlu0 %1377, %v342_v33   ;;  %845 = vrot.lane.b32.xlu1 %v1635_v32, %s1474_s7 }
 0x1ff   :  { %851 = vrot.lane.b32.xlu0 %v1643_v34, %s1474_s7  ;;  %849 = vrot.lane.b32.xlu1 %v1648_v35, %s1474_s7 }
 0x203   :  { %880 = vrot.lane.b32.xlu0 %v1561_v1, %s1475_s20  ;;  %878 = vrot.lane.b32.xlu1 %v1556_v0, %s1475_s20 }
 0x207   :  { %884 = vrot.lane.b32.xlu0 %v1575_v3, %s1475_s20  ;;  %882 = vrot.lane.b32.xlu1 %v1570_v2, %s1475_s20 }
 0x20b   :  { %888 = vrot.lane.b32.xlu0 %v1627_v30, %s1475_s20  ;;  %886 = vrot.lane.b32.xlu1 %v1635_v32, %s1475_s20 }
 0x20f   :  { %892 = vrot.lane.b32.xlu0 %v1643_v34, %s1475_s20  ;;  %890 = vrot.lane.b32.xlu1 %v1648_v35, %s1475_s20 }
 0x23a   :  { %v377_v36 = vpop.permute.xlu1 %376  ;;  %v380_v37 = vpop.permute.xlu0 %379 }
 0x23b   :  { %v474_v38 = vrot.slane %v377_v36, %v1589_v8  ;;  %v478_v39 = vrot.slane %v380_v37, %v1589_v8 }
 0x23d   :  { %v599_v40 = vsel %vm151_vm1, %v478_v39, %v474_v38 }
 0x23e   :  { %v401_v41 = vpop.permute.xlu1 %400  ;;  %v404_v42 = vpop.permute.xlu0 %403 }
 0x23f   :  { %v506_v43 = vrot.slane %v401_v41, %v1589_v8  ;;  %v510_v44 = vrot.slane %v404_v42, %v1589_v8 }
 0x241   :  { %v612_v45 = vsel %vm151_vm1, %v510_v44, %v506_v43 }
 0x242   :  { %v425_v46 = vpop.permute.xlu1 %424  ;;  %v428_v47 = vpop.permute.xlu0 %427 }
 0x243   :  { %v538_v49 = vrot.slane %v425_v46, %v1589_v8  ;;  %v542_v52 = vrot.slane %v428_v47, %v1589_v8 }
 0x245   :  { %v619_v53 = vsel %vm151_vm1, %v542_v52, %v538_v49 }
 0x246   :  { %v449_v54 = vpop.permute.xlu1 %448  ;;  %v452_v55 = vpop.permute.xlu0 %451 }
 0x247   :  { %v570_v57 = vrot.slane %v449_v54, %v1589_v8  ;;  %v574_v58 = vrot.slane %v452_v55, %v1589_v8 }
 0x249   :  { %v626_v59 = vsel %vm151_vm1, %v574_v58, %v570_v57 }
 0x24a   :  { %v383_v60 = vpop.permute.xlu1 %382  ;;  %v407_v61 = vpop.permute.xlu0 %406 }
 0x24b   :  { %v482_v62 = vrot.slane %v383_v60, %v1589_v8  ;;  %v514_v63 = vrot.slane %v407_v61, %v1589_v8 }
 0x24d   :  { %v601_v5 = vsel %vm600_vm3, %v482_v62, %v599_v40  ;;  %v613_v7 = vsel %vm600_vm3, %v514_v63, %v612_v45 }
 0x24e   :  { %v431_v9 = vpop.permute.xlu1 %430  ;;  %v455_v10 = vpop.permute.xlu0 %454 }
 0x24f   :  { %v546_v11 = vrot.slane %v431_v9, %v1589_v8  ;;  %v578_v14 = vrot.slane %v455_v10, %v1589_v8 }
 0x251   :  { %v620_v15 = vsel %vm600_vm3, %v546_v11, %v619_v53  ;;  %v627_v16 = vsel %vm600_vm3, %v578_v14, %v626_v59  ;;  %vm637_vm3 = vcmask 15360  }
 0x252   :  { %v386_v6 = vpop.permute.xlu1 %385  ;;  %v410_v17 = vpop.permute.xlu0 %409 }
 0x253   :  { %v486_v12 = vrot.slane %v386_v6, %v1589_v8  ;;  %v518_v18 = vrot.slane %v410_v17, %v1589_v8 }
 0x255   :  { %v603_v19 = vsel %vm602_vm4, %v486_v12, %v601_v5  ;;  %v614_v21 = vsel %vm602_vm4, %v518_v18, %v613_v7  ;;  %v1697_v18 = vadd.s32 128, %v1582_v4 }
 0x256   :  { %v434_v22 = vpop.permute.xlu1 %433  ;;  %v458_v13 = vpop.permute.xlu0 %457 }
 0x257   :  { %v550_v23 = vrot.slane %v434_v22, %v1589_v8  ;;  %v582_v24 = vrot.slane %v458_v13, %v1589_v8 }
 0x259   :  { %v621_v25 = vsel %vm602_vm4, %v550_v23, %v620_v15  ;;  %v628_v26 = vsel %vm602_vm4, %v582_v24, %v627_v16  ;;  %v697_v23 = vand.u32 255, %v1582_v4 }
 0x25a   :  { %v389_v27 = vpop.permute.xlu1 %388  ;;  %v413_v28 = vpop.permute.xlu0 %412 }
 0x25b   :  { %v490_v29 = vrot.slane %v389_v27, %v1589_v8  ;;  %v522_v31 = vrot.slane %v413_v28, %v1589_v8  ;;  %v1714_v27 = vadd.s32 256, %v1582_v4 }
 0x25d   :  { %v605_v33 = vsel %vm604_vm5, %v490_v29, %v603_v19  ;;  %v615_v36 = vsel %vm604_vm5, %v522_v31, %v614_v21  ;;  %v745_v31 = vand.u32 15, %v697_v23 }
 0x25e   :  { %v437_v37 = vpop.permute.xlu1 %436  ;;  %v461_v38 = vpop.permute.xlu0 %460 }
 0x25f   :  { %v554_v39 = vrot.slane %v437_v37, %v1589_v8  ;;  %v586_v40 = vrot.slane %v461_v38, %v1589_v8  ;;  %v711_v38 = vand.u32 255, %v1714_v27  ;;  %vm789_vm9 = vcmp.gt.s32.totalorder %v745_v31, 0 }
 0x260   :  { %vm801_vm12 = vcmp.lt.s32.totalorder %v745_v31, 15 }
 0x261   :  { %v622_v41 = vsel %vm604_vm5, %v554_v39, %v621_v25  ;;  %v629_v42 = vsel %vm604_vm5, %v586_v40, %v628_v26  ;;  %v704_v25 = vand.u32 255, %v1697_v18  ;;  %v1728_v39 = vadd.s32 384, %v1582_v4 }
 0x262   :  { %v392_v43 = vpop.permute.xlu1 %391  ;;  %v416_v44 = vpop.permute.xlu0 %415  ;;  %vm815_vm4 = vcmp.ge.s32.totalorder %v711_v38, 16 }
 0x263   :  { %v494_v45 = vrot.slane %v392_v43, %v1589_v8  ;;  %v526_v46 = vrot.slane %v416_v44, %v1589_v8 }
 0x265   :  { %v607_v47 = vsel %vm606_vm6, %v494_v45, %v605_v33  ;;  %v616_v49 = vsel %vm606_vm6, %v526_v46, %v615_v36  ;;  %v752_v36 = vand.u32 15, %v704_v25  ;;  %v759_v45 = vand.u32 15, %v711_v38 }
 0x266   :  { %v440_v52 = vpop.permute.xlu1 %439  ;;  %v464_v53 = vpop.permute.xlu0 %463  ;;  %v718_v46 = vand.u32 255, %v1728_v39 }
 0x267   :  { %v558_v54 = vrot.slane %v440_v52, %v1589_v8  ;;  %v590_v55 = vrot.slane %v464_v53, %v1589_v8  ;;  %vm790_vm10 = vcmp.gt.s32.totalorder %v752_v36, 0  ;;  %v858_v53 = vsel %vm853_vm11, %v1608_v48, %v1612_v50 }
 0x268   :  { %vm791_vm14 = vcmp.gt.s32.totalorder %v759_v45, 0  ;;  %vm802_vm15 = vcmp.lt.s32.totalorder %v752_v36, 15  ;;  %vm803_vm1 = vcmp.lt.s32.totalorder %v759_v45, 15  ;;  %vm828_vm5 = vcmp.lt.s32.totalorder %v718_v46, 240 }
 0x269   :  { %v623_v57 = vsel %vm606_vm6, %v558_v54, %v622_v41  ;;  %v630_v58 = vsel %vm606_vm6, %v590_v55, %v629_v42  ;;  %v1476_v42 = vmov 0.0   ;;  %vm935_vm6 = vcmp.lt.s32.totalorder %v1582_v4, 16 }
 0x26a   :  { %v395_v59 = vpop.permute.xlu1 %394  ;;  %v419_v60 = vpop.permute.xlu0 %418  ;;  %v1323_v52 = vsel %vm790_vm10, 1.0, %v1476_v42  ;;  %v1333_v39 = vsel %vm828_vm5, 1.0, %v1476_v42  ;;  %vm1039_vm10 = vcmask 261120  }
 0x26b   :  { %v498_v61 = vrot.slane %v395_v59, %v1589_v8  ;;  %v530_v62 = vrot.slane %v419_v60, %v1589_v8  ;;  %v766_v59 = vand.u32 15, %v718_v46 }
 0x26d   :  { %v617_v63 = vsel %vm608_vm7, %v530_v62, %v616_v49  ;;  %v609_v5 = vsel %vm608_vm7, %v498_v61, %v607_v47  ;;  %v863_v62 = vmul.f32 %v1323_v52, %v858_v53  ;;  %vm792_vm0 = vcmp.gt.s32.totalorder %v766_v59, 0 }
 0x26e   :  { %v443_v7 = vpop.permute.xlu1 %442  ;;  %v467_v9 = vpop.permute.xlu0 %466  ;;  %vm804_vm2 = vcmp.lt.s32.totalorder %v766_v59, 15  ;;  %v1325_v31 = vsel %vm792_vm0, 1.0, %v1476_v42 }
 0x26f   :  { %v562_v10 = vrot.slane %v443_v7, %v1589_v8  ;;  %v594_v11 = vrot.slane %v467_v9, %v1589_v8 }
 0x271   :  { %v624_v14 = vsel %vm608_vm7, %v562_v10, %v623_v57  ;;  %v631_v15 = vsel %vm608_vm7, %v594_v11, %v630_v58  ;;  %v1326_v57 = vsel %vm801_vm12, 1.0, %v1476_v42  ;;  %v859_v58 = vsel %vm853_vm11, %v1614_v51, %v1617_v56 }
 0x272   :  { %v398_v16 = vpop.permute.xlu1 %397  ;;  %v422_v6 = vpop.permute.xlu0 %421  ;;  %v867_v10 = vmul.f32 %v1323_v52, %v859_v58  ;;  %v1324_v11 = vsel %vm791_vm14, 1.0, %v1476_v42  ;;  %v1329_v52 = vsel %vm804_vm2, 1.0, %v1476_v42  ;;  %vm1888_vm7 = vcmp.ge.s32.totalorder %v697_v23, 16 }
 0x273   :  { %v502_v17 = vrot.slane %v398_v16, %v1589_v8  ;;  %v534_v12 = vrot.slane %v422_v6, %v1589_v8 }
 0x274   :  { %v875_v36 = vadd.f32 %v867_v10, %v1575_v3  ;;  %v1479_v10 = vmov 32  }
 0x275   :  { %v1700_v19 = vsel %vm610_vm8, %v534_v12, %v617_v63  ;;  %v1703_v21 = vsel %vm610_vm8, %v502_v17, %v609_v5  ;;  %1379 = vset.pattern.permute.xlu1 %v1479_v10  ;;  %1380 = vset.pattern.permute.xlu0 %v1479_v10 }
 0x276   :  { %v446_v22 = vpop.permute.xlu1 %445  ;;  %v1705_v13 = vpop.permute.xlu0 %847 }
 0x277   :  { %v566_v24 = vrot.slane %v446_v22, %v1589_v8  ;;  %v871_v22 = vadd.f32 %v863_v62, %v1570_v2 }
 0x279   :  { %v1711_v26 = vsel %vm610_vm8, %v566_v24, %v624_v14  ;;  %v857_v14 = vsel %vm853_vm11, %v1617_v56, %v1705_v13 }
 0x27a   :  { %v1716_v28 = vpop.permute.xlu1 %845  ;;  %v470_v29 = vpop.permute.xlu0 %469  ;;  %v868_v24 = vmul.f32 %v1324_v11, %v857_v14 }
 0x27b   :  { %v598_v33 = vrot.slane %v470_v29, %v1589_v8  ;;  %v1322_v8 = vsel %vm789_vm9, 1.0, %v1476_v42  ;;  %v856_v29 = vsel %vm853_vm11, %v1612_v50, %v1716_v28  ;;  %vm1895_vm9 = vcmp.lt.s32.totalorder %v704_v25, 240 }
 0x27d   :  { %v1724_v37 = vsel %vm610_vm8, %v598_v33, %v631_v15  ;;  %v1327_v15 = vsel %vm802_vm15, 1.0, %v1476_v42  ;;  %v1328_v33 = vsel %vm803_vm1, 1.0, %v1476_v42  ;;  %vm976_vm8 = vcmp.lt.s32.totalorder %v1582_v4, 112  ;;  %v1466_v4 = vld [vmem:[%s2156_s0 + $0x18] sm:$0xff] }
 0x27e   :  { %v1730_v40 = vpop.permute.xlu1 %849  ;;  %v852_v41 = vpop.permute.xlu0 %851 }
 0x27f   :  { %v860_v43 = vsel %vm853_vm11, %v1730_v40, %v1608_v48  ;;  %v861_v44 = vsel %vm853_vm11, %v852_v41, %v1614_v51  ;;  %v855_v2 = vsel %vm853_vm11, %v1705_v13, %v852_v41  ;;  %v876_v41 = vadd.f32 %v868_v24, %v1627_v30 }
 0x280   :  { %v862_v54 = vmul.f32 %v1322_v8, %v860_v43  ;;  %v866_v55 = vmul.f32 %v1322_v8, %v861_v44  ;;  %v869_v3 = vmul.f32 %v1325_v31, %v855_v2 }
 0x282   :  { %v1744_v47 = vpop.permute.xlu1 %878  ;;  %v881_v49 = vpop.permute.xlu0 %880  ;;  %v870_v5 = vadd.f32 %v862_v54, %v1556_v0  ;;  %v874_v7 = vadd.f32 %v866_v55, %v1561_v1  ;;  %v864_v54 = vmul.f32 %v1324_v11, %v856_v29 }
 0x286   :  { %v883_v60 = vpop.permute.xlu1 %882  ;;  %v885_v61 = vpop.permute.xlu0 %884 }
 0x287   :  { %v899_v48 = vsel %vm894_vm13, %v1744_v47, %v883_v60  ;;  %v900_v63 = vsel %vm894_vm13, %v881_v49, %v885_v61 }
 0x288   :  { %v903_v51 = vmul.f32 %v1326_v57, %v899_v48  ;;  %v907_v9 = vmul.f32 %v1326_v57, %v900_v63  ;;  %v854_v57 = vsel %vm853_vm11, %v1716_v28, %v1730_v40  ;;  %v877_v48 = vadd.f32 %v869_v3, %v1643_v34 }
 0x289   :  { %v865_v62 = vmul.f32 %v1325_v31, %v854_v57  ;;  %v641_v34 = vsel %vm637_vm3, %v1700_v19, 0.0  ;;  %v12_v19 = vld [vmem:[%s2157_s1] sm:$0xff] }
 0x28a   :  { %v887_v16 = vpop.permute.xlu1 %886  ;;  %v889_v6 = vpop.permute.xlu0 %888  ;;  %v1772_v17 = vadd.f32 %v903_v51, %v870_v5  ;;  %v1774_v0 = vadd.f32 %v907_v9, %v874_v7  ;;  %v638_v7 = vsel %vm637_vm3, %v1703_v21, 0.0  ;;  %v15_v51 = vld [vmem:[%s2157_s1 + $0x18] sm:$0xff] }
 0x28b   :  { %v897_v1 = vsel %vm894_vm13, %v883_v60, %v887_v16  ;;  %v898_v12 = vsel %vm894_vm13, %v885_v61, %v889_v6  ;;  %v873_v5 = vadd.f32 %v865_v62, %v1648_v35  ;;  %v644_v35 = vsel %vm637_vm3, %v1711_v26, 0.0  ;;  %v13_v26 = vld [vmem:[%s2157_s1 + $0x8] sm:$0xff] }
 0x28c   :  { %v904_v56 = vmul.f32 %v1327_v15, %v897_v1  ;;  %919 = vrot.lane.b32.xlu1 %v1772_v17, %s1477_s21  ;;  %921 = vrot.lane.b32.xlu0 %v1774_v0, %s1477_s21  ;;  %v908_v8 = vmul.f32 %v1327_v15, %v898_v12  ;;  %v1856_v21 = vpack.c.bf16 %v13_v26, %v12_v19 }
 0x28e   :  { %v891_v43 = vpop.permute.xlu1 %890  ;;  %v893_v44 = vpop.permute.xlu0 %892  ;;  %v1796_v45 = vadd.f32 %v904_v56, %v871_v22  ;;  %v1812_v60 = vadd.f32 %v908_v8, %v875_v36 }
 0x28f   :  { %v895_v50 = vsel %vm894_vm13, %v887_v16, %v891_v43  ;;  %v896_v53 = vsel %vm894_vm13, %v889_v6, %v893_v44  ;;  %v902_v13 = vsel %vm894_vm13, %v893_v44, %v881_v49  ;;  %v901_v30 = vsel %vm894_vm13, %v891_v43, %v1744_v47 }
 0x290   :  { %v909_v55 = vmul.f32 %v1328_v33, %v896_v53  ;;  %923 = vrot.lane.b32.xlu1 %v1796_v45, %s1477_s21  ;;  %v905_v58 = vmul.f32 %v1328_v33, %v895_v50  ;;  %v910_v59 = vmul.f32 %v1329_v52, %v902_v13  ;;  %v872_v49 = vadd.f32 %v864_v54, %v1635_v32 }
 0x291   :  { %v906_v28 = vmul.f32 %v1329_v52, %v901_v30  ;;  %v647_v47 = vsel %vm637_vm3, %v1724_v37, 0.0  ;;  %v14_v37 = vld [vmem:[%s2157_s1 + $0x10] sm:$0xff] }
 0x292   :  { %v1814_v61 = vadd.f32 %v909_v55, %v876_v41  ;;  %v1825_v40 = vadd.f32 %v905_v58, %v872_v49  ;;  %v1827_v63 = vadd.f32 %v910_v59, %v877_v48  ;;  %v1864_v9 = vpack.c.bf16 %v15_v51, %v14_v37 }
 0x293   :  { %v1834_v32 = vadd.f32 %v906_v28, %v873_v5  ;;  %v1331_v58 = vsel %vm815_vm4, 1.0, %v1476_v42 }
 0x294   :  { %925 = vrot.lane.b32.xlu1 %v1812_v60, %s1477_s21  ;;  %929 = vrot.lane.b32.xlu0 %v1814_v61, %s1477_s21 }
 0x298   :  { %927 = vrot.lane.b32.xlu1 %v1825_v40, %s1477_s21  ;;  %933 = vrot.lane.b32.xlu0 %v1827_v63, %s1477_s21 }
 0x29c   :  { %931 = vrot.lane.b32.xlu1 %v1834_v32, %s1477_s21  ;;  %962 = vrot.lane.b32.xlu0 %v1774_v0, %s1478_s22 }
 0x2a0   :  { %960 = vrot.lane.b32.xlu1 %v1772_v17, %s1478_s22 }
 0x2a4   :  { %964 = vrot.lane.b32.xlu1 %v1796_v45, %s1478_s22 }
 0x2bb   :  { %642 = vadd.xlane.f32.xlu0 %v641_v34 }
 0x2bf   :  { %645 = vadd.xlane.f32.xlu0 %v644_v35 }
 0x2c3   :  { %648 = vadd.xlane.f32.xlu0 %v647_v47 }
 0x2c8   :  { %639 = vadd.xlane.f32.xlu1 %v638_v7  ;;  %v1330_v7 = vsel %vm1888_vm7, 1.0, %v1476_v42 }
 0x2d9   :  { %968 = vrot.lane.b32.xlu1 %v1825_v40, %s1478_s22  ;;  %966 = vrot.lane.b32.xlu0 %v1812_v60, %s1478_s22 }
 0x2dd   :  { %972 = vrot.lane.b32.xlu1 %v1834_v32, %s1478_s22  ;;  %970 = vrot.lane.b32.xlu0 %v1814_v61, %s1478_s22 }
 0x2e1   :  { %974 = vrot.lane.b32.xlu0 %v1827_v63, %s1478_s22  ;;  %1021 = vperm.xlu1 %1379, %v12_v19   ;;  %v1332_v19 = vsel %vm1895_vm9, 1.0, %v1476_v42 }
 0x2e5   :  { %1026 = vperm.xlu0 %1380, %v13_v26   ;;  %1031 = vperm.xlu1 %1379, %v14_v37  }
 0x2e9   :  { %1036 = vperm.xlu1 %1379, %v15_v51  }
 0x2fe   :  { %v1866_v11 = vpop.permute.xlu1 %919  ;;  %v1868_v15 = vpop.permute.xlu0 %921 }
 0x302   :  { %v924_v14 = vpop.permute.xlu1 %923 }
 0x303   :  { %v940_v10 = vsel %vm935_vm6, %v1866_v11, %v924_v14 }
 0x306   :  { %v930_v16 = vpop.permute.xlu0 %929  ;;  %v926_v6 = vpop.permute.xlu1 %925 }
 0x307   :  { %v939_v49 = vsel %vm935_vm6, %v926_v6, %v930_v16 }
 0x308   :  { %v950_v35 = vmul.f32 %v1331_v58, %v939_v49 }
 0x30a   :  { %v934_v1 = vpop.permute.xlu0 %933  ;;  %v928_v12 = vpop.permute.xlu1 %927 }
 0x30b   :  { %v938_v18 = vsel %vm935_vm6, %v924_v14, %v928_v12  ;;  %v937_v62 = vsel %vm935_vm6, %v930_v16, %v934_v1  ;;  %v941_v16 = vsel %vm935_vm6, %v1868_v15, %v926_v6 }
 0x30c   :  { %v946_v47 = vmul.f32 %v1331_v58, %v938_v18  ;;  %v959_v26 = vadd.f32 %v937_v62, %v1827_v63  ;;  %v943_v63 = vsel %vm935_vm6, %v934_v1, %v1868_v15  ;;  %v957_v15 = vadd.f32 %v941_v16, %v1812_v60 }
 0x30d   :  { %v948_v1 = vmul.f32 %v1330_v7, %v943_v63 }
 0x30e   :  { %v1870_v22 = vpop.permute.xlu0 %962  ;;  %v1872_v24 = vpop.permute.xlu1 %931 }
 0x30f   :  { %v936_v48 = vsel %vm935_vm6, %v928_v12, %v1872_v24 }
 0x310   :  { %v955_v37 = vadd.f32 %v936_v48, %v1834_v32 }
 0x312   :  { %v1874_v29 = vpop.permute.xlu1 %960 }
 0x316   :  { %v1876_v8 = vpop.permute.xlu1 %964 }
 0x348   :  { %v643_v56 = vpop.xlane.xlu0 %642 }
 0x349   :  { %v1319_v33 = vmul.f32 -1.442695, %v643_v56 }
 0x34c   :  { %v646_v31 = vpop.xlane.xlu0 %645 }
 0x34d   :  { %v1320_v2 = vmul.f32 -1.442695, %v646_v31 }
 0x34f   :  { %1381 = vpow2.f32 %v1320_v2 }
 0x350   :  { %v649_v36 = vpop.xlane.xlu0 %648  ;;  %1383 = vpow2.f32 %v1319_v33 }
 0x351   :  { %v1321_v43 = vmul.f32 -1.442695, %v649_v36  ;;  %v958_v36 = vadd.f32 %v950_v35, %v1814_v61  ;;  %v1461_v61 = vld [vmem:[%s2156_s0 + $0x48] sm:$0xff]  ;;  %v1468_v35 = vld [vmem:[%s2156_s0 + $0x10] sm:$0xff] }
 0x353   :  { %1385 = vpow2.f32 %v1321_v43  ;;  %v954_v43 = vadd.f32 %v946_v47, %v1825_v40 }
 0x354   :  { %v1878_v44 = vpop.permute.xlu0 %966 }
 0x355   :  { %v640_v52 = vpop.xlane.xlu1 %639 }
 0x356   :  { %v1318_v50 = vmul.f32 -1.442695, %v640_v52  ;;  %v953_v52 = vadd.f32 %v940_v10, %v1796_v45  ;;  %v1462_v45 = vld [vmem:[%s2156_s0 + $0x58] sm:$0xff] }
 0x358   :  { %v971_v53 = vpop.permute.xlu0 %970  ;;  %1387 = vpow2.f32 %v1318_v50  ;;  %v942_v50 = vsel %vm935_vm6, %v1872_v24, %v1866_v11  ;;  %v1464_v24 = vld [vmem:[%s2156_s0 + $0x50] sm:$0xff] }
 0x359   :  { %v1382_v13 = vpop.eup %1381  ;;  %v969_v41 = vpop.permute.xlu1 %968  ;;  %v980_v12 = vsel %vm976_vm8, %v1878_v44, %v971_v53  ;;  %v944_v58 = vmul.f32 %v1330_v7, %v942_v50 }
 0x35a   :  { %v664_v54 = vadd.f32 1.0, %v1382_v13  ;;  %v1384_v3 = vpop.eup %1383  ;;  %v979_v42 = vsel %vm976_vm8, %v1876_v8, %v969_v41  ;;  %v990_v2 = vmul.f32 %v1332_v19, %v980_v12 }
 0x35b   :  { %v663_v25 = vadd.f32 1.0, %v1384_v3  ;;  %v986_v33 = vmul.f32 %v1332_v19, %v979_v42 }
 0x35c   :  { %v975_v55 = vpop.permute.xlu0 %974  ;;  %1389 = vrcp.f32 %v664_v54 }
 0x35d   :  { %v1386_v57 = vpop.eup %1385  ;;  %v973_v59 = vpop.permute.xlu1 %972  ;;  %v984_v46 = vsel %vm976_vm8, %v975_v55, %v1870_v22  ;;  %v978_v14 = vsel %vm976_vm8, %v971_v53, %v975_v55  ;;  %v1463_v55 = vld [vmem:[%s2156_s0 + $0x40] sm:$0xff]  ;;  %v994_v30 = vadd.f32 %v986_v33, %v953_v52 }
 0x35e   :  { %v665_v27 = vadd.f32 1.0, %v1386_v57  ;;  %v983_v23 = vsel %vm976_vm8, %v973_v59, %v1874_v29  ;;  %v992_v28 = vmul.f32 %v1333_v39, %v984_v46  ;;  %v977_v6 = vsel %vm976_vm8, %v969_v41, %v973_v59 }
 0x35f   :  { %v988_v5 = vmul.f32 %v1333_v39, %v983_v23  ;;  %v999_v13 = vadd.f32 %v978_v14, %v958_v36  ;;  %v995_v54 = vadd.f32 %v977_v6, %v954_v43  ;;  %v998_v59 = vadd.f32 %v990_v2, %v957_v15 }
 0x360   :  { %1391 = vrcp.f32 %v665_v27  ;;  %v1000_v32 = vadd.f32 %v992_v28, %v959_v26  ;;  %v982_v27 = vsel %vm976_vm8, %v1870_v22, %v1878_v44  ;;  %v956_v23 = vadd.f32 %v948_v1, %v1774_v0  ;;  %v1465_v0 = vld [vmem:[%s2156_s0 + $0x8] sm:$0xff] }
 0x361   :  { %1393 = vrcp.f32 %v663_v25  ;;  %v996_v56 = vadd.f32 %v988_v5, %v955_v37  ;;  %v1007_v49 = vmul.f32 0.11111111, %v999_v13  ;;  %v1003_v18 = vmul.f32 0.11111111, %v995_v54  ;;  %v1022_v42 = vpop.permute.xlu1 %1021 }
 0x362   :  { %v1388_v34 = vpop.eup %1387  ;;  %v1008_v41 = vmul.f32 0.11111111, %v1000_v32  ;;  %v981_v25 = vsel %vm976_vm8, %v1874_v29, %v1876_v8  ;;  %v952_v28 = vadd.f32 %v944_v58, %v1772_v17  ;;  %v997_v5 = vadd.f32 %v982_v27, %v956_v23  ;;  %v1467_v8 = vld [vmem:[%s2156_s0] sm:$0xff] }
 0x363   :  { %v662_v51 = vadd.f32 1.0, %v1388_v34  ;;  %v1004_v3 = vmul.f32 0.11111111, %v996_v56  ;;  %v1006_v34 = vmul.f32 0.11111111, %v998_v59  ;;  %v1017_v19 = vpack.c.bf16 %v1007_v49, %v1003_v18 }
 0x364   :  { %v1002_v22 = vmul.f32 0.11111111, %v994_v30  ;;  %v993_v7 = vadd.f32 %v981_v25, %v952_v28  ;;  %v1027_v32 = vpop.permute.xlu0 %1026 }
 0x365   :  { %1395 = vrcp.f32 %v662_v51  ;;  %v1018_v62 = vpack.c.bf16 %v1008_v41, %v1004_v3  ;;  %v1005_v51 = vmul.f32 0.11111111, %v997_v5  ;;  %v2000_v43 = vpop.permute.xlu1 %1031 }
 0x366   :  { %v1390_v31 = vpop.eup %1389  ;;  %v1016_v10 = vpack.c.bf16 %v1006_v34, %v1002_v22  ;;  %v1001_v16 = vmul.f32 0.11111111, %v993_v7 }
 0x367   :  { %v679_v40 = vmul.f32 %v1461_v61, %v1390_v31  ;;  %v678_v11 = vmul.f32 %v1463_v55, %v1390_v31 }
 0x368   :  { %v1015_v12 = vpack.c.bf16 %v1005_v51, %v1001_v16 }
 0x369   :  { %v1037_v55 = vpop.permute.xlu1 %1036 }
 0x36a   :  { %v1392_v53 = vpop.eup %1391 }
 0x36b   :  { %v681_v60 = vmul.f32 %v1462_v45, %v1392_v53  ;;  %v680_v57 = vmul.f32 %v1464_v24, %v1392_v53  ;;  %v1394_v46 = vpop.eup %1393 }
 0x36c   :  { %v677_v29 = vmul.f32 %v1466_v4, %v1394_v46  ;;  %v676_v47 = vmul.f32 %v1468_v35, %v1394_v46 }
 0x36d   :  { %v1014_v38 = vpack.c.bf16 %v681_v60, %v679_v40  ;;  %v1013_v39 = vpack.c.bf16 %v680_v57, %v678_v11 }
 0x36f   :  { %1099 = vmatprep.subr.bf16.mxu1 %v1014_v38  ;;  %v1396_v48 = vpop.eup %1395 }
 0x370   :  { %1100 = vmatpush1.bf16.msra.mxu1 %v1013_v39  ;;  %v675_v44 = vmul.f32 %v1465_v0, %v1396_v48  ;;  %v674_v17 = vmul.f32 %v1467_v8, %v1396_v48 }
 0x371   :  { %1101 = vmatprep.subr.bf16.mxu1 %v1018_v62 }
 0x372   :  { %v1012_v26 = vpack.c.bf16 %v677_v29, %v675_v44  ;;  %v1011_v37 = vpack.c.bf16 %v676_v47, %v674_v17 }
 0x374   :  { %1102 = vmatpush1.bf16.msra.mxu1 %v1017_v19  ;;  %1046 = vmatprep.subr.bf16.mxu0 %v1012_v26 }
 0x375   :  { %1047 = vmatpush1.bf16.msra.mxu0 %v1011_v37 }
 0x376   :  { %1048 = vmatprep.subr.bf16.mxu0 %v1016_v10 }
 0x377   :  { %1336 = vmatmul.mubr.msk.bf16.vlgmr.msra.gmra.mrb[0].mxu1 %vm1039_vm10, %v1856_v21 }
 0x378   :  { %1141 = vmatprep.mubr.bf16.mxu1 %v1473_v20 }
 0x379   :  { %1049 = vmatpush1.bf16.msra.mxu0 %v1015_v12 }
 0x37c   :  { %1334 = vmatmul.mubr.msk.bf16.vlgmr.msra.gmra.mrb[0].mxu0 %vm1039_vm10, %v1856_v21 }
 0x37d   :  { %1088 = vmatprep.mubr.bf16.mxu0 %v1473_v20 }
 0x37f   :  { %1337 = vmatmul.mubr.msk.bf16.gmra.mrb[4].mxu1 %vm1039_vm10, %v1864_v9 }
 0x384   :  { %1335 = vmatmul.mubr.msk.bf16.gmra.mrb[4].mxu0 %vm1039_vm10, %v1864_v9 }
 0x44a   :  { %v1133_v63 = vpop.f32.mrb[0].mxu1 }
 0x44b   :  { %v1990_v56 = vadd.f32 %v1133_v63, %v1022_v42  ;;  %v1135_v14 = vpop.f32.mrb[1].mxu1 }
 0x44c   :  { %v1992_v6 = vadd.f32 %v1135_v14, %v1022_v42  ;;  %v1137_v31 = vpop.f32.mrb[2].mxu1 }
 0x44d   :  { %v1340_v2 = vmul.f32 -1.442695, %v1990_v56  ;;  %v1995_v33 = vadd.f32 %v1137_v31, %v1027_v32  ;;  %v1139_v21 = vpop.f32.mrb[3].mxu1 }
 0x44e   :  { %v1341_v20 = vmul.f32 -1.442695, %v1992_v6  ;;  %v1998_v36 = vadd.f32 %v1139_v21, %v1027_v32 }
 0x44f   :  { %1397 = vpow2.f32 %v1340_v2  ;;  %v1344_v9 = vmul.f32 -1.442695, %v1995_v33  ;;  %v1080_v15 = vpop.f32.mrb[0].mxu0 }
 0x450   :  { %1399 = vpow2.f32 %v1341_v20  ;;  %v1345_v52 = vmul.f32 -1.442695, %v1998_v36  ;;  %v2004_v1 = vadd.f32 %v1080_v15, %v1022_v42  ;;  %v1082_v50 = vpop.f32.mrb[1].mxu0 }
 0x451   :  { %1401 = vpow2.f32 %v1344_v9  ;;  %v2006_v53 = vadd.f32 %v1082_v50, %v1022_v42  ;;  %v1084_v13 = vpop.f32.mrb[2].mxu0 }
 0x452   :  { %1403 = vpow2.f32 %v1345_v52  ;;  %v1143_v41 = vpop.f32.mrb[4].mxu1  ;;  %v1338_v54 = vmul.f32 -1.442695, %v2004_v1  ;;  %v2009_v3 = vadd.f32 %v1084_v13, %v1027_v32  ;;  %v1086_v61 = vpop.f32.mrb[3].mxu0  ;;  %v1355_v13 = vld [vmem:[%s2156_s0 + $0x48] sm:$0xff] }
 0x453   :  { %v2012_v40 = vadd.f32 %v1143_v41, %v2000_v43  ;;  %v1145_v45 = vpop.f32.mrb[5].mxu1  ;;  %v1339_v60 = vmul.f32 -1.442695, %v2006_v53  ;;  %v2015_v11 = vadd.f32 %v1086_v61, %v1027_v32 }
 0x454   :  { %v2018_v24 = vadd.f32 %v1145_v45, %v2000_v43  ;;  %v1147_v57 = vpop.f32.mrb[6].mxu1  ;;  %1405 = vpow2.f32 %v1338_v54  ;;  %v1342_v58 = vmul.f32 -1.442695, %v2009_v3  ;;  %v1356_v45 = vld [vmem:[%s2156_s0 + $0x50] sm:$0xff] }
 0x455   :  { %v1348_v59 = vmul.f32 -1.442695, %v2012_v40  ;;  %v2022_v30 = vadd.f32 %v1147_v57, %v1037_v55  ;;  %v1149_v27 = vpop.f32.mrb[7].mxu1  ;;  %1407 = vpow2.f32 %v1339_v60  ;;  %v1343_v38 = vmul.f32 -1.442695, %v2015_v11 }
 0x456   :  { %v1349_v39 = vmul.f32 -1.442695, %v2018_v24  ;;  %1409 = vpow2.f32 %v1342_v58  ;;  %v2027_v23 = vadd.f32 %v1149_v27, %v1037_v55 }
 0x457   :  { %v1352_v46 = vmul.f32 -1.442695, %v2022_v30  ;;  %1411 = vpow2.f32 %v1343_v38  ;;  %v1090_v49 = vpop.f32.mrb[4].mxu0 }
 0x458   :  { %1413 = vpow2.f32 %v1348_v59  ;;  %v2030_v25 = vadd.f32 %v1090_v49, %v2000_v43  ;;  %v1092_v62 = vpop.f32.mrb[5].mxu0  ;;  %v1353_v29 = vmul.f32 -1.442695, %v2027_v23  ;;  %v1264_v49 = vld [vmem:[%s2156_s0] sm:$0xff] }
 0x459   :  { %v1398_v18 = vpop.eup %1397  ;;  %1415 = vpow2.f32 %v1349_v39  ;;  %v1094_v5 = vpop.f32.mrb[6].mxu0  ;;  %v2035_v37 = vadd.f32 %v1092_v62, %v2000_v43  ;;  %v1354_v43 = vld [vmem:[%s2156_s0 + $0x40] sm:$0xff] }
 0x45a   :  { %v1400_v48 = vpop.eup %1399  ;;  %v1202_v28 = vadd.f32 1.0, %v1398_v18  ;;  %1417 = vpow2.f32 %v1352_v46  ;;  %v1096_v0 = vpop.f32.mrb[7].mxu0  ;;  %v1346_v17 = vmul.f32 -1.442695, %v2030_v25  ;;  %v2037_v16 = vadd.f32 %v1094_v5, %v1037_v55 }
 0x45b   :  { %v1402_v34 = vpop.eup %1401  ;;  %v1203_v22 = vadd.f32 1.0, %v1400_v48  ;;  %v2039_v63 = vadd.f32 %v1096_v0, %v1037_v55  ;;  %v1347_v21 = vmul.f32 -1.442695, %v2035_v37  ;;  %v1265_v48 = vld [vmem:[%s2156_s0 + $0x8] sm:$0xff] }
 0x45c   :  { %v1404_v44 = vpop.eup %1403  ;;  %1419 = vrcp.f32 %v1202_v28  ;;  %v1206_v4 = vadd.f32 1.0, %v1402_v34  ;;  %v1350_v52 = vmul.f32 -1.442695, %v2037_v16  ;;  %v1266_v34 = vld [vmem:[%s2156_s0 + $0x10] sm:$0xff] }
 0x45d   :  { %1421 = vrcp.f32 %v1203_v22  ;;  %v1207_v8 = vadd.f32 1.0, %v1404_v44  ;;  %v1351_v41 = vmul.f32 -1.442695, %v2039_v63  ;;  %v1267_v44 = vld [vmem:[%s2156_s0 + $0x18] sm:$0xff] }
 0x45e   :  { %1423 = vrcp.f32 %v1206_v4  ;;  %v1406_v35 = vpop.eup %1405 }
 0x45f   :  { %1425 = vrcp.f32 %v1207_v8  ;;  %v1408_v47 = vpop.eup %1407  ;;  %v1200_v7 = vadd.f32 1.0, %v1406_v35 }
 0x460   :  { %1427 = vpow2.f32 %v1353_v29  ;;  %v1410_v19 = vpop.eup %1409  ;;  %v1201_v26 = vadd.f32 1.0, %v1408_v47 }
 0x461   :  { %1429 = vpow2.f32 %v1346_v17  ;;  %v1412_v51 = vpop.eup %1411  ;;  %v1204_v10 = vadd.f32 1.0, %v1410_v19 }
 0x462   :  { %1431 = vrcp.f32 %v1200_v7  ;;  %v1414_v12 = vpop.eup %1413  ;;  %v1205_v42 = vadd.f32 1.0, %v1412_v51 }
 0x463   :  { %1433 = vrcp.f32 %v1201_v26  ;;  %v1416_v32 = vpop.eup %1415  ;;  %v1210_v14 = vadd.f32 1.0, %v1414_v12 }
 0x464   :  { %1435 = vrcp.f32 %v1204_v10  ;;  %v1418_v31 = vpop.eup %1417  ;;  %v1211_v2 = vadd.f32 1.0, %v1416_v32 }
 0x465   :  { %1437 = vrcp.f32 %v1205_v42  ;;  %v1214_v9 = vadd.f32 1.0, %v1418_v31 }
 0x466   :  { %v1420_v20 = vpop.eup %1419  ;;  %1439 = vrcp.f32 %v1210_v14 }
 0x467   :  { %v1422_v15 = vpop.eup %1421  ;;  %v1250_v50 = vmul.f32 %v1420_v20, %v1990_v56  ;;  %1441 = vrcp.f32 %v1211_v2  ;;  %v1357_v56 = vld [vmem:[%s2156_s0 + $0x58] sm:$0xff] }
 0x468   :  { %v1424_v54 = vpop.eup %1423  ;;  %v1251_v61 = vmul.f32 %v1422_v15, %v1992_v6  ;;  %1443 = vrcp.f32 %v1214_v9 }
 0x469   :  { %v1426_v60 = vpop.eup %1425  ;;  %v1297_v55 = vadd.f32 %v1354_v43, %v1250_v50  ;;  %v1254_v57 = vmul.f32 %v1424_v54, %v1995_v33  ;;  %1445 = vpow2.f32 %v1347_v21  ;;  %v1268_v43 = vld [vmem:[%s2156_s0 + $0x20] sm:$0xff]  ;;  %v1270_v54 = vld [vmem:[%s2156_s0 + $0x30] sm:$0xff] }
 0x46a   :  { %v1428_v58 = vpop.eup %1427  ;;  %v1298_v59 = vadd.f32 %v1355_v13, %v1251_v61  ;;  %v1255_v27 = vmul.f32 %v1426_v60, %v1998_v36  ;;  %1447 = vpow2.f32 %v1350_v52  ;;  %v1472_v52 = vld [vmem:[%s2156_s0 + $0x78] sm:$0xff]  ;;  %v1269_v13 = vld [vmem:[%s2156_s0 + $0x28] sm:$0xff] }
 0x46b   :  { %v1430_v6 = vpop.eup %1429  ;;  %1362 = vst [vmem:[%s2158_s2 + $0x40] sm:$0xff] %v1297_v55  ;;  %v1299_v38 = vadd.f32 %v1356_v45, %v1254_v57  ;;  %v1215_v39 = vadd.f32 1.0, %v1428_v58  ;;  %1449 = vpow2.f32 %v1351_v41  ;;  %v1271_v60 = vld [vmem:[%s2156_s0 + $0x38] sm:$0xff] }
 0x46c   :  { %v1432_v46 = vpop.eup %1431  ;;  %1363 = vst [vmem:[%s2158_s2 + $0x48] sm:$0xff] %v1298_v59  ;;  %v1300_v33 = vadd.f32 %v1357_v56, %v1255_v27  ;;  %v1208_v36 = vadd.f32 1.0, %v1430_v6 }
 0x46d   :  { %v1434_v18 = vpop.eup %1433  ;;  %1364 = vst [vmem:[%s2158_s2 + $0x50] sm:$0xff] %v1299_v38  ;;  %v1248_v62 = vmul.f32 %v1432_v46, %v2004_v1  ;;  %1451 = vrcp.f32 %v1215_v39 }
 0x46e   :  { %v1436_v28 = vpop.eup %1435  ;;  %1365 = vst [vmem:[%s2158_s2 + $0x58] sm:$0xff] %v1300_v33  ;;  %v1249_v5 = vmul.f32 %v1434_v18, %v2006_v53  ;;  %1453 = vrcp.f32 %v1208_v36 }
 0x46f   :  { %v1438_v22 = vpop.eup %1437  ;;  %v1272_v0 = vadd.f32 %v1264_v49, %v1248_v62  ;;  %v1252_v1 = vmul.f32 %v1436_v28, %v2009_v3 }
 0x470   :  { %v1440_v4 = vpop.eup %1439  ;;  %v1273_v29 = vadd.f32 %v1265_v48, %v1249_v5  ;;  %v1253_v8 = vmul.f32 %v1438_v22, %v2015_v11  ;;  %v1469_v11 = vld [vmem:[%s2156_s0 + $0x60] sm:$0xff] }
 0x471   :  { %v1442_v17 = vpop.eup %1441  ;;  %1280 = vst [vmem:[%s2158_s2] sm:$0xff] %v1272_v0  ;;  %v1274_v53 = vadd.f32 %v1266_v34, %v1252_v1  ;;  %v1258_v35 = vmul.f32 %v1440_v4, %v2012_v40 }
 0x472   :  { %v1444_v47 = vpop.eup %1443  ;;  %1281 = vst [vmem:[%s2158_s2 + $0x8] sm:$0xff] %v1273_v29  ;;  %v1275_v3 = vadd.f32 %v1267_v44, %v1253_v8  ;;  %v1259_v7 = vmul.f32 %v1442_v17, %v2018_v24  ;;  %v1470_v24 = vld [vmem:[%s2156_s0 + $0x68] sm:$0xff] }
 0x473   :  { %v1446_v19 = vpop.eup %1445  ;;  %1282 = vst [vmem:[%s2158_s2 + $0x10] sm:$0xff] %v1274_v53  ;;  %v1301_v26 = vadd.f32 %v1469_v11, %v1258_v35  ;;  %v1262_v40 = vmul.f32 %v1444_v47, %v2022_v30  ;;  %v1471_v30 = vld [vmem:[%s2156_s0 + $0x70] sm:$0xff] }
 0x474   :  { %v1448_v51 = vpop.eup %1447  ;;  %1283 = vst [vmem:[%s2158_s2 + $0x18] sm:$0xff] %v1275_v3  ;;  %v1302_v10 = vadd.f32 %v1470_v24, %v1259_v7  ;;  %v1209_v12 = vadd.f32 1.0, %v1446_v19 }
 0x475   :  { %v1450_v42 = vpop.eup %1449  ;;  %1366 = vst [vmem:[%s2158_s2 + $0x60] sm:$0xff] %v1301_v26  ;;  %v1303_v32 = vadd.f32 %v1471_v30, %v1262_v40  ;;  %v1212_v14 = vadd.f32 1.0, %v1448_v51 }
 0x476   :  { %1367 = vst [vmem:[%s2158_s2 + $0x68] sm:$0xff] %v1302_v10  ;;  %1455 = vrcp.f32 %v1209_v12  ;;  %v1213_v31 = vadd.f32 1.0, %v1450_v42 }
 0x477   :  { %v1452_v2 = vpop.eup %1451  ;;  %1368 = vst [vmem:[%s2158_s2 + $0x70] sm:$0xff] %v1303_v32  ;;  %1457 = vrcp.f32 %v1212_v14 }
 0x478   :  { %v1454_v21 = vpop.eup %1453  ;;  %v1263_v20 = vmul.f32 %v1452_v2, %v2027_v23  ;;  %1459 = vrcp.f32 %v1213_v31 }
 0x479   :  { %v1256_v9 = vmul.f32 %v1454_v21, %v2030_v25 }
 0x47a   :  { %v1304_v15 = vadd.f32 %v1472_v52, %v1263_v20 }
 0x47b   :  { %v1276_v50 = vadd.f32 %v1268_v43, %v1256_v9 }
 0x47c   :  { %1369 = vst [vmem:[%s2158_s2 + $0x78] sm:$0xff] %v1304_v15 }
 0x47d   :  { %1284 = vst [vmem:[%s2158_s2 + $0x20] sm:$0xff] %v1276_v50 }
 0x480   :  { %v1456_v23 = vpop.eup %1455 }
 0x481   :  { %v1458_v25 = vpop.eup %1457  ;;  %v1257_v41 = vmul.f32 %v1456_v23, %v2035_v37 }
 0x482   :  { %v1460_v61 = vpop.eup %1459  ;;  %v1260_v45 = vmul.f32 %v1458_v25, %v2037_v16 }
 0x483   :  { %v1277_v55 = vadd.f32 %v1269_v13, %v1257_v41  ;;  %v1261_v57 = vmul.f32 %v1460_v61, %v2039_v63 }
 0x484   :  { %v1278_v56 = vadd.f32 %v1270_v54, %v1260_v45 }
 0x485   :  { %1285 = vst [vmem:[%s2158_s2 + $0x28] sm:$0xff] %v1277_v55  ;;  %v1279_v37 = vadd.f32 %v1271_v60, %v1261_v57 }
 0x486   :  { %1286 = vst [vmem:[%s2158_s2 + $0x30] sm:$0xff] %v1278_v56 }
 0x487   :  { %1287 = vst [vmem:[%s2158_s2 + $0x38] sm:$0xff] %v1279_v37 }

</bundles_post_ra>
